<compile_context>
chip_gen: v6e
topology: v6e:2x2x1
jax: 0.10.0
libtpu: 0.0.40
codegen_flags: <defaults>
</compile_context>

<pallas_src>
import functools

import numpy as np
import jax
import jax.numpy as jnp
from jax import lax
from jax.experimental import pallas as pl
from jax.experimental.pallas import tpu as pltpu


def ada_embedding_bag_kernel(bag_ids_ref, idx_ref, inv_cnt_ref, w_ref,
                             o_ref, member_ref, *, w_precision):
    """One (bag_tile, v_tile) grid step of the bag-mean as MXU matmuls.

    bag_ids_ref : VMEM (1, N_pad)    int32  bag id per token (-1 for padding)
    idx_ref     : VMEM (N_pad, 1)    int32  remapped row id per token
    inv_cnt_ref : VMEM (TB, 1)       f32    1/count per bag (0 for empty bags)
    w_ref       : VMEM (TV, D_pad)   bf16/f32  V-tile of the embedding table
    o_ref       : VMEM (TB, D_pad)   f32    per-bag output (resident across vt)
    member_ref  : VMEM (TB, N_pad)   bf16   bag-membership scratch (per bt)
    """
    bt = pl.program_id(0)
    vt = pl.program_id(1)
    last_vt = pl.num_programs(1) - 1

    tb = o_ref.shape[0]
    n_pad = bag_ids_ref.shape[1]
    tv = w_ref.shape[0]

    # Bag membership depends only on the bag tile -> build once per bt and
    # reuse for every V tile.  Values are exact 0/1 (bf16 exact).
    @pl.when(vt == 0)
    def _build_membership():
        row_ids = lax.broadcasted_iota(jnp.int32, (tb, n_pad), 0) + bt * tb
        member_ref[...] = (bag_ids_ref[...] == row_ids).astype(member_ref.dtype)

    # One-hot of remapped token rows for this V tile (N_pad, TV).  Masking the
    # column for global row 0 implements `weight[0] = 0` without rewriting the
    # table (row 0 still counts toward the mean denominator, as in
    # F.embedding_bag).
    col_ids = lax.broadcasted_iota(jnp.int32, (n_pad, tv), 1) + vt * tv
    one_hot = ((idx_ref[...] == col_ids) & (col_ids != 0)).astype(jnp.bfloat16)

    # MXU matmul #1 (single native bf16 pass, exact: operands are 0/1 and the
    # accumulation is f32): per-bag per-vocab-row counts S (TB, TV).
    s = jnp.dot(member_ref[...], one_hot, preferred_element_type=jnp.float32)

    # MXU matmul #2: partial (unscaled) bag sums for this V tile.  Counts are
    # small integers, so the cast to the table dtype is exact for counts<=256.
    contrib = jnp.dot(s.astype(w_ref.dtype), w_ref[...],
                      preferred_element_type=jnp.float32,
                      precision=w_precision)

    @pl.when(vt == 0)
    def _first():
        o_ref[...] = contrib

    @pl.when(vt > 0)
    def _accumulate():
        o_ref[...] += contrib

    # Epilogue: apply per-bag 1/count (mode='mean'; 0 for empty bags).
    @pl.when(vt == last_vt)
    def _finalize():
        o_ref[...] = o_ref[...] * inv_cnt_ref[...]


def _round_up(x, m):
    return (x + m - 1) // m * m


def _vmem_limit_bytes(default=64 * 1024 * 1024):
    # v5e/v6e have 128 MiB of VMEM per TensorCore, v7x only 64 MiB; leave the
    # compiler ~25% headroom instead of hard-coding one number.
    try:
        return int(pltpu.get_tpu_info().vmem_capacity_bytes * 3 // 4)
    except Exception:
        return default


def ada_embedding_bag(input_idx, offsets, weight, dic, offset, *,
                      bag_tile=256, v_tile=256, table_dtype=jnp.bfloat16):
    """JAX/Pallas equivalent of AdaEmbeddingBag.forward (embedding_bag, mean).

    table_dtype=jnp.bfloat16 streams the table at half the HBM bytes (the
    kernel reads the whole V x D table every call) and runs matmul #2 as one
    native-bf16 MXU pass (~1e-3 rel error); use table_dtype=jnp.float32 for
    near-f32 accuracy (Precision.HIGH, 3 MXU passes).
    """
    input_idx = input_idx.astype(jnp.int32)
    offsets = offsets.astype(jnp.int32)
    dic = dic.astype(jnp.int32)
    table_dtype = np.dtype(table_dtype)

    n = int(input_idx.shape[0])
    num_bags = int(offsets.shape[0])
    v_rows, d = weight.shape
    out_dtype = weight.dtype

    # Hoisted remap dic[input + offset] (plain gather; note JAX clamps
    # out-of-range indices where PyTorch would raise).
    idx = jnp.take(dic, input_idx + jnp.int32(offset))

    # Per-token bag id (offsets monotone with offsets[0] == 0, same contract
    # as F.embedding_bag); empty bags fall out naturally.
    token_pos = jnp.arange(n, dtype=jnp.int32)
    bag_ids = (jnp.searchsorted(offsets, token_pos, side="right") - 1
               ).astype(jnp.int32)

    # Per-bag 1/count (0 for empty bags -> zero rows, mode='mean').
    ends = jnp.concatenate([offsets[1:], jnp.array([n], jnp.int32)])
    counts = (ends - offsets).astype(jnp.float32)
    inv_counts = jnp.where(counts > 0, 1.0 / counts, 0.0).astype(jnp.float32)

    # ---- tiling ----------------------------------------------------------
    # Bag tile: large (MXU M dim + per-grid-step overhead amortization) but
    # capped so the "parallel" bag axis keeps >= 2 tiles (v7x has 2 TCs).
    tb = max(8, _round_up(bag_tile, 8))
    if num_bags > 8:
        tb = min(tb, max(8, _round_up((num_bags + 1) // 2, 8)))
    else:
        tb = 8
    # V tile: contraction dim of matmul #2; multiples of 128 keep the
    # in-kernel one-hot lane-dense and feed the 256-wide MXU on v6e/v7x.
    tv = min(_round_up(max(v_tile, 128), 128), _round_up(v_rows, 128))
    n_pad = _round_up(max(n, 128), 128)          # lane dim of matmul #1
    b_pad = _round_up(num_bags, tb)
    v_pad = _round_up(v_rows, tv)
    d_pad = _round_up(d, 128)                    # lane-dense output stores

    bag_ids_p = jnp.full((1, n_pad), -1, jnp.int32).at[0, :n].set(bag_ids)
    idx_p = jnp.zeros((n_pad, 1), jnp.int32).at[:n, 0].set(idx)
    inv_p = jnp.zeros((b_pad, 1), jnp.float32).at[:num_bags, 0].set(inv_counts)

    # Table: pad/cast only when necessary.
    # TODO(synk): for large tables, prepare (pad + cast) the table once at
    # module init and cache it across calls instead of per forward.
    if weight.shape == (v_pad, d_pad) and weight.dtype == table_dtype:
        w_p = weight
    elif weight.shape == (v_pad, d_pad):
        w_p = weight.astype(table_dtype)
    else:
        w_p = (jnp.zeros((v_pad, d_pad), table_dtype)
               .at[:v_rows, :d].set(weight.astype(table_dtype)))

    w_precision = (None if table_dtype == np.dtype(jnp.bfloat16)
                   else lax.Precision.HIGH)

    grid = (b_pad // tb, v_pad // tv)

    out = pl.pallas_call(
        functools.partial(ada_embedding_bag_kernel, w_precision=w_precision),
        out_shape=jax.ShapeDtypeStruct((b_pad, d_pad), jnp.float32),
        grid_spec=pltpu.PrefetchScalarGridSpec(
            num_scalar_prefetch=0,
            grid=grid,
            in_specs=[
                pl.BlockSpec((1, n_pad), lambda b, k: (0, 0)),    # bag ids
                pl.BlockSpec((n_pad, 1), lambda b, k: (0, 0)),    # remapped idx
                pl.BlockSpec((tb, 1), lambda b, k: (b, 0)),       # 1/count
                pl.BlockSpec((tv, d_pad), lambda b, k: (k, 0)),   # weight tile
            ],
            out_specs=pl.BlockSpec((tb, d_pad), lambda b, k: (b, 0)),
            scratch_shapes=[pltpu.VMEM((tb, n_pad), jnp.bfloat16)],  # membership
        ),
        compiler_params=pltpu.CompilerParams(
            dimension_semantics=("parallel", "arbitrary"),
            vmem_limit_bytes=_vmem_limit_bytes(),
        ),
    )(bag_ids_p, idx_p, inv_p, w_p)

    # TODO(synk): add a D-tiling ("parallel") grid axis and token(N) chunking
    # for very large D / N, and a scalar-prefetch list of touched V tiles so
    # all-zero tiles of S skip both the DMA and matmul #2.
    return out[:num_bags, :d].astype(out_dtype)


def ada_embedding_bag_ref(input_idx, offsets, weight, dic, offset):
    """Pure NumPy reference (mirrors F.embedding_bag, mode='mean')."""
    weight = np.asarray(weight).copy()
    weight[0] = 0.0
    idx = np.asarray(dic)[np.asarray(input_idx) + offset]
    n = idx.shape[0]
    starts = np.asarray(offsets)
    ends = np.concatenate([starts[1:], np.array([n], starts.dtype)])
    out = np.zeros((starts.shape[0], weight.shape[1]), np.float32)
    for b in range(starts.shape[0]):
        rows = idx[starts[b]:ends[b]]
        if rows.size:
            out[b] = weight[rows].mean(axis=0)
    return out


if __name__ == "__main__":
    key = jax.random.PRNGKey(0)
    k_w, k_dic, k_in = jax.random.split(key, 3)

    V = 512          # embedding rows -> 2 V tiles of 256 (tile-aligned: no pad copy)
    D = 128          # embedding dim (lane-aligned)
    DIC_SIZE = 256   # remap-table size
    OFFSET = 3       # self.offset

    # 12 bags over 64 tokens, including empty bags (-> 2 bag tiles of 8).
    bag_sizes = [5, 0, 7, 3, 6, 0, 8, 4, 9, 2, 10, 10]
    N = int(sum(bag_sizes))
    offsets = jnp.array(np.cumsum([0] + bag_sizes[:-1]), jnp.int32)

    weight = jax.random.normal(k_w, (V, D), jnp.float32)
    dic = jax.random.randint(k_dic, (DIC_SIZE,), 0, V, dtype=jnp.int32)
    input_idx = jax.random.randint(k_in, (N,), 0, DIC_SIZE - OFFSET,
                                   dtype=jnp.int32)

    out = ada_embedding_bag(input_idx, offsets, weight, dic, OFFSET)
    out = jax.block_until_ready(out)

    ref = ada_embedding_bag_ref(np.asarray(input_idx), np.asarray(offsets),
                                np.asarray(weight), np.asarray(dic), OFFSET)
    assert out.shape == ref.shape, (out.shape, ref.shape)
    # bf16 table stream -> ~1e-3 relative error vs the f32 reference.
    err = np.max(np.abs(np.asarray(out) - ref))
    assert np.allclose(np.asarray(out), ref, atol=1e-2, rtol=1e-2), err

    print("KERNEL_OK")
</pallas_src>

<mosaic_0001>
module attributes {stable_mosaic.version = 11 : i64} {
  func.func @ada_embedding_bag_kernel(%arg0: i32, %arg1: i32, %arg2: memref<1x128xi32, #tpu.memory_space<vmem>>, %arg3: memref<128x1xi32, #tpu.memory_space<vmem>>, %arg4: memref<8x1xf32, #tpu.memory_space<vmem>>, %arg5: memref<256x128xbf16, #tpu.memory_space<vmem>>, %arg6: memref<8x128xf32, #tpu.memory_space<vmem>>, %arg7: memref<8x128xbf16, #tpu.memory_space<vmem>>) attributes {dimension_semantics = [#tpu.dimension_semantics<parallel>, #tpu.dimension_semantics<arbitrary>], iteration_bounds = array<i64: 2, 2>, scalar_prefetch = 0 : i64, scratch_operands = 1 : i64, tpu.core_type = #tpu.core_type<tc>, window_params = [{pipeline_mode = #tpu.pipeline_mode<synchronous>, transform_indices = @transform_0, window_bounds = array<i64: 1, 128>}, {pipeline_mode = #tpu.pipeline_mode<synchronous>, transform_indices = @transform_1, window_bounds = array<i64: 128, 1>}, {transform_indices = @transform_2, window_bounds = array<i64: 8, 1>}, {transform_indices = @transform_3, window_bounds = array<i64: 256, 128>}, {transform_indices = @transform_4, window_bounds = array<i64: 8, 128>}]} {
    %c0_i32 = arith.constant 0 : i32
    %0 = arith.cmpi eq, %arg1, %c0_i32 : i32
    %1 = arith.extui %0 : i1 to i32
    %c0_i32_0 = arith.constant 0 : i32
    %2 = arith.cmpi ne, %1, %c0_i32_0 : i32
    scf.if %2 {
      %30 = tpu.iota {dimensions = array<i32: 0>} : vector<8x128xi32>
      %c8_i32 = arith.constant 8 : i32
      %31 = arith.muli %arg0, %c8_i32 : i32
      %32 = vector.broadcast %31 : i32 to vector<8x128xi32>
      %33 = arith.addi %30, %32 : vector<8x128xi32>
      %c0_13 = arith.constant 0 : index
      %c0_14 = arith.constant 0 : index
      %34 = vector.load %arg2[%c0_13, %c0_14] : memref<1x128xi32, #tpu.memory_space<vmem>>, vector<1x128xi32>
      %35 = vector.broadcast %34 : vector<1x128xi32> to vector<8x128xi32>
      %36 = arith.cmpi eq, %35, %33 : vector<8x128xi32>
      %37 = arith.extui %36 : vector<8x128xi1> to vector<8x128xi32>
      %38 = arith.sitofp %37 : vector<8x128xi32> to vector<8x128xf32>
      %39 = arith.truncf %38 : vector<8x128xf32> to vector<8x128xbf16>
      %c0_15 = arith.constant 0 : index
      %c0_16 = arith.constant 0 : index
      %40 = vector.load %arg7[%c0_15, %c0_16] : memref<8x128xbf16, #tpu.memory_space<vmem>>, vector<8x128xbf16>
      tpu.vector_store %arg7[%c0_15, %c0_16], %39 {strides = array<i32>} : memref<8x128xbf16, #tpu.memory_space<vmem>>, vector<8x128xbf16>,
    } else {
    }
    %3 = tpu.iota {dimensions = array<i32: 1>} : vector<128x256xi32>
    %c256_i32 = arith.constant 256 : i32
    %4 = arith.muli %arg1, %c256_i32 : i32
    %5 = vector.broadcast %4 : i32 to vector<128x256xi32>
    %6 = arith.addi %3, %5 : vector<128x256xi32>
    %c0 = arith.constant 0 : index
    %c0_1 = arith.constant 0 : index
    %7 = vector.load %arg3[%c0, %c0_1] : memref<128x1xi32, #tpu.memory_space<vmem>>, vector<128x1xi32>
    %8 = vector.broadcast %7 : vector<128x1xi32> to vector<128x256xi32>
    %9 = arith.cmpi eq, %8, %6 : vector<128x256xi32>
    %c0_i32_2 = arith.constant 0 : i32
    %10 = vector.broadcast %c0_i32_2 : i32 to vector<128x256xi32>
    %11 = arith.cmpi ne, %6, %10 : vector<128x256xi32>
    %12 = arith.andi %9, %11 : vector<128x256xi1>
    %13 = arith.extui %12 : vector<128x256xi1> to vector<128x256xi32>
    %14 = arith.sitofp %13 : vector<128x256xi32> to vector<128x256xf32>
    %15 = arith.truncf %14 : vector<128x256xf32> to vector<128x256xbf16>
    %c0_3 = arith.constant 0 : index
    %c0_4 = arith.constant 0 : index
    %16 = vector.load %arg7[%c0_3, %c0_4] : memref<8x128xbf16, #tpu.memory_space<vmem>>, vector<8x128xbf16>
    %cst = arith.constant dense<0.000000e+00> : vector<8x256xf32>
    %17 = tpu.matmul %16, %15, %cst {dimension_numbers = #tpu.dot_dimension_numbers<[1], [0], [0], [1], [0, 0, 1, 1], [], []>} : vector<8x128xbf16>, vector<128x256xbf16>, vector<8x256xf32> -> vector<8x256xf32>
    %18 = arith.truncf %17 : vector<8x256xf32> to vector<8x256xbf16>
    %c0_5 = arith.constant 0 : index
    %c0_6 = arith.constant 0 : index
    %19 = vector.load %arg5[%c0_5, %c0_6] : memref<256x128xbf16, #tpu.memory_space<vmem>>, vector<256x128xbf16>
    %cst_7 = arith.constant dense<0.000000e+00> : vector<8x128xf32>
    %20 = tpu.matmul %18, %19, %cst_7 {dimension_numbers = #tpu.dot_dimension_numbers<[1], [0], [0], [1], [0, 0, 1, 1], [], []>} : vector<8x256xbf16>, vector<256x128xbf16>, vector<8x128xf32> -> vector<8x128xf32>
    %c0_i32_8 = arith.constant 0 : i32
    %21 = arith.cmpi eq, %arg1, %c0_i32_8 : i32
    %22 = arith.extui %21 : i1 to i32
    %c0_i32_9 = arith.constant 0 : i32
    %23 = arith.cmpi ne, %22, %c0_i32_9 : i32
    scf.if %23 {
      %c0_13 = arith.constant 0 : index
      %c0_14 = arith.constant 0 : index
      %30 = vector.load %arg6[%c0_13, %c0_14] : memref<8x128xf32, #tpu.memory_space<vmem>>, vector<8x128xf32>
      tpu.vector_store %arg6[%c0_13, %c0_14], %20 {strides = array<i32>} : memref<8x128xf32, #tpu.memory_space<vmem>>, vector<8x128xf32>,
    } else {
    }
    %c0_i32_10 = arith.constant 0 : i32
    %24 = arith.cmpi sgt, %arg1, %c0_i32_10 : i32
    %25 = arith.extui %24 : i1 to i32
    %c0_i32_11 = arith.constant 0 : i32
    %26 = arith.cmpi ne, %25, %c0_i32_11 : i32
    scf.if %26 {
      %c0_13 = arith.constant 0 : index
      %c0_14 = arith.constant 0 : index
      %30 = vector.load %arg6[%c0_13, %c0_14] : memref<8x128xf32, #tpu.memory_space<vmem>>, vector<8x128xf32>
      %31 = arith.addf %30, %20 : vector<8x128xf32>
      %c0_15 = arith.constant 0 : index
      %c0_16 = arith.constant 0 : index
      %32 = vector.load %arg6[%c0_15, %c0_16] : memref<8x128xf32, #tpu.memory_space<vmem>>, vector<8x128xf32>
      tpu.vector_store %arg6[%c0_15, %c0_16], %31 {strides = array<i32>} : memref<8x128xf32, #tpu.memory_space<vmem>>, vector<8x128xf32>,
    } else {
    }
    %c1_i32 = arith.constant 1 : i32
    %27 = arith.cmpi eq, %arg1, %c1_i32 : i32
    %28 = arith.extui %27 : i1 to i32
    %c0_i32_12 = arith.constant 0 : i32
    %29 = arith.cmpi ne, %28, %c0_i32_12 : i32
    scf.if %29 {
      %c0_13 = arith.constant 0 : index
      %c0_14 = arith.constant 0 : index
      %30 = vector.load %arg6[%c0_13, %c0_14] : memref<8x128xf32, #tpu.memory_space<vmem>>, vector<8x128xf32>
      %c0_15 = arith.constant 0 : index
      %c0_16 = arith.constant 0 : index
      %31 = vector.load %arg4[%c0_15, %c0_16] : memref<8x1xf32, #tpu.memory_space<vmem>>, vector<8x1xf32>
      %32 = vector.broadcast %31 : vector<8x1xf32> to vector<8x128xf32>
      %33 = arith.mulf %30, %32 : vector<8x128xf32>
      %c0_17 = arith.constant 0 : index
      %c0_18 = arith.constant 0 : index
      %34 = vector.load %arg6[%c0_17, %c0_18] : memref<8x128xf32, #tpu.memory_space<vmem>>, vector<8x128xf32>
      tpu.vector_store %arg6[%c0_17, %c0_18], %33 {strides = array<i32>} : memref<8x128xf32, #tpu.memory_space<vmem>>, vector<8x128xf32>,
    } else {
    }
    return
  }
  func.func @transform_0(%arg0: i32, %arg1: i32) -> (i32, i32) {
    %c0_i32 = arith.constant 0 : i32
    %c0_i32_0 = arith.constant 0 : i32
    %c0_i32_1 = arith.constant 0 : i32
    return %c0_i32, %c0_i32_0 : i32, i32
  }
  func.func @transform_1(%arg0: i32, %arg1: i32) -> (i32, i32) {
    %c0_i32 = arith.constant 0 : i32
    %c0_i32_0 = arith.constant 0 : i32
    %c0_i32_1 = arith.constant 0 : i32
    return %c0_i32, %c0_i32_0 : i32, i32
  }
  func.func @transform_2(%arg0: i32, %arg1: i32) -> (i32, i32) {
    %c0_i32 = arith.constant 0 : i32
    %c0_i32_0 = arith.constant 0 : i32
    return %arg0, %c0_i32 : i32, i32
  }
  func.func @transform_3(%arg0: i32, %arg1: i32) -> (i32, i32) {
    %c0_i32 = arith.constant 0 : i32
    %c0_i32_0 = arith.constant 0 : i32
    return %arg1, %c0_i32 : i32, i32
  }
  func.func @transform_4(%arg0: i32, %arg1: i32) -> (i32, i32) {
    %c0_i32 = arith.constant 0 : i32
    %c0_i32_0 = arith.constant 0 : i32
    return %arg0, %c0_i32 : i32, i32
  }
}

</mosaic_0001>

<bundles_post_ra>
// kernel: tpu_custom_call.1
= control target key start
LH: loop header
LB: loop body
LE: loop exit
PB: predicated region body
PF: predicated region fallthrough
CT: control target
= control target key end

     0   :  { %9 = vsyncpa [#allocation4], 0  ;;  %s1713_s0 = inlined_call_operand.vmem [shape: s32[1,128], index: 0, kind: input, shape index: {}]   ;;  %s1714_s1 = inlined_call_operand.vmem [shape: s32[128,1], index: 1, kind: input, shape index: {}]   ;;  %s1715_s2 = inlined_call_operand.vmem [shape: f32[16,1], index: 2, kind: input, shape index: {}]   ;;  %s1716_s3 = inlined_call_operand.hbm [shape: bf16[512,128], index: 3, kind: input, shape index: {}]   ;;  %s1717_s4 = inlined_call_operand.hbm [shape: f32[16,128], index: 4, kind: output, shape index: {}]  }
   0x1   :  { %11 = vsyncpa [#allocation4 + $0x1], 0 }
   0x2   :  { %12 = vsyncpa [#allocation5], 0 }
   0x3   :  { %14 = vsyncpa [#allocation5 + $0x1], 0  ;;  %s1262_s15 = smov 0   ;;  %s1264_s16 = smov 0  }
   0x4   :  { %s1266_s17 = smov 0   ;;  %s1268_s18 = smov 0  }
   0x5   :  { %s1270_s19 = smov 0   ;;  %s1272_s20 = smov 0  }
   0x6   :  { %s1274_s21 = smov 0   ;;  %s1276_s22 = smov 0  }
   0x7   :  { %s1278_s23 = smov 0   ;;  %s1280_s24 = smov 0  }
   0x8   :  { %s1282_s25 = smov 0  }
   0x9 LB: > { %1722 = sst [smem:[#allocation9_spill]] %s1219_s23  ;;  %s826_s26 = sadd.s32 4294967295, %s1227_s25   ;;  %s1227_s25 = sphi %s1282_s25, %s20_s25   ;;  %s1223_s24 = sphi %s1280_s24, %s1757_s24   ;;  %s1219_s23 = sphi %s1278_s23, %s1756_s23   ;;  %s1215_s22 = sphi %s1276_s22, %s1755_s22   ;;  %s1211_s21 = sphi %s1274_s21, %s1754_s21   ;;  %s1207_s20 = sphi %s1272_s20, %s1763_s20   ;;  %s1203_s19 = sphi %s1270_s19, %s1762_s19   ;;  %s1199_s18 = sphi %s1268_s18, %s1761_s18   ;;  %s1195_s17 = sphi %s1266_s17, %s1760_s17   ;;  %s1191_s16 = sphi %s1264_s16, %s1759_s16   ;;  %s1187_s15 = sphi %s1262_s15, %s1758_s15  }
   0xa   : > { %1723 = sst [smem:[#allocation10_spill]] %s1223_s24  ;;  %s827_s27 = sadd.s32 4294967294, %s1227_s25  }
   0xb   : > { %s29_s28 = sadd.s32 1, %s1219_s23  ;;  %s32_s29 = sadd.s32 1, %s1223_s24 }
   0xc   : > { %p30_p0 = scmp.ge.s32.totalorder %s29_s28, 2  ;;  %s107_s30 = sadd.s32 1, %s1207_s20 }
   0xd   : > { %p114_p1 = scmp.ne.s32.totalorder %s1207_s20, %s1203_s19  ;;  %p115_p2 = scmp.eq.s32.totalorder %s1227_s25, 0 }
   0xe   : > { %s1765_s28 = smov (%p30_p0, %s29_s28), 0  ;;  %s1767_s29 = smov (!%p30_p0, %s32_s29), %s1223_s24 }
   0xf   : > { %1724 = sst [smem:[#allocation11_spill]] %s1765_s28  ;;  %s104_s5 = ssub.s32 %s1219_s23, %s1765_s28 }
  0x10   : > { %p1328_p3 = por %p115_p2, %p114_p1  ;;  %p34_p4 = scmp.ge.s32.totalorder %s1767_s29, 2 }
  0x11   : > { %p105_p5 = scmp.eq.s32.totalorder %s104_s5, 0  ;;  %p120_p6 = scmp.ne.s32.totalorder %s1203_s19, %s1199_s18 }
  0x12   : > { %p121_p7 = scmp.eq.s32.totalorder %s826_s26, 0  ;;  %s1769_s29 = smov (%p34_p4, %s1767_s29), 0 }
  0x13   : > { %1726 = sst [smem:[#allocation12_spill]] %s1769_s29  ;;  %s130_s9 = ssub.s32 %s1223_s24, %s1769_s29 }
  0x14   : > { %s1336_s7 = scalar_select %p105_p5, %s1207_s20, %s107_s30  }
  0x15   : > { %p1338_p8 = por %p121_p7, %p120_p6  ;;  %p131_p9 = scmp.eq.s32.totalorder %s130_s9, 0 }
  0x16   : > { %1727 = sst [smem:[#allocation13_spill]] %s1336_s7  ;;  %s133_s10 = sadd.s32 1, %s1195_s17 }
  0x17   : > { %p143_p10 = scmp.ne.s32.totalorder %s1195_s17, %s1191_s16  ;;  %p144_p11 = scmp.eq.s32.totalorder %s826_s26, 3 }
  0x18   : > { %s1348_s11 = scalar_select %p131_p9, %s1195_s17, %s133_s10  }
  0x19   : > { %p1350_p12 = por %p144_p11, %p143_p10  ;;  %p149_p13 = scmp.ne.s32.totalorder %s1191_s16, %s1187_s15 }
  0x1a   : > { %p150_p0 = scmp.eq.s32.totalorder %s827_s27, 3  ;;  %p964_p1 = scmp.lt.s32.totalorder %s1227_s25, 4 }
  0x1b   : > { %s183_s13 = sand.u32 1, %s1207_s20   ;;  %s929_s30 = sshll.u32 %s1219_s23, 11 }
  0x1c   : > { %p1358_p2 = por %p150_p0, %p149_p13  ;;  %s830_s18 = sshll.u32 %s183_s13, 7 }
  0x1d   : > { %s193_s26 = scalar_lea.hbm %s1716_s3, %s929_s30  ;;  %s187_s10 = scalar_lea.vmem [#allocation3], %s830_s18 }
  0x1e   : > { %s194_s29 = sshll.u32 %s187_s10, 4  ;;  %p1368_p4 = pnand %p964_p1, %p1328_p3  ;;  %s195_s29 = int_to_ptr.vmem [resolvable:$true] %s194_s29 }
  0x1f   : > { %s184_s27 = scalar_lea.sflag [#allocation4], %s183_s13  ;;  %s1092_s24 = scalar_lea.vmem %s195_s29, 2048 }
  0x20   : > { %p1081_p5 = pneg %p1368_p4  ;;  %p1093_p6 = scmp.ne.s32.totalorder %s195_s29, %s1092_s24 }
  0x21   : > { %s1229_s23 = smov [#allocation3]  }
  0x22   : > { %p1095_p7 = pnand %p1093_p6, %p1081_p5  ;;  %s1097_s7 = sshll.u32 %s1229_s23, 4  ;;  %s1098_s7 = int_to_ptr.vmem [resolvable:$false] %s1097_s7 }
  0x23   : > { %s1099_s30 = scalar_lea.vmem %s1098_s7, 4096  ;;  %p1100_p10 = scmp.lt.s32.totalorder %s195_s29, %s1098_s7 }
  0x24   : > { %p1096_p9 = pneg %p1095_p7  ;;  %p1101_p11 = scmp.lt.s32.totalorder %s1099_s30, %s1092_s24 }
  0x26   : > { %p1102_p13 = por %p1101_p11, %p1100_p10 }
  0x28   : > { %p1103_p3 = pnand %p1102_p13, %p1096_p9 }
  0x2a   : > { %1106 = shalt.err (!%p1103_p3)
}
  0x2b   : > { %s1230_s6 = smov 64   ;;  %s1231_s13 = smov 4  }
  0x2c   : > { %959 = dma.hbm_to_vmem [thread:$0]  (!%p1368_p4), %s193_s26, 2048, %s195_s29, %s184_s27, %s1230_s6, %s1230_s6, %s1231_s13  }
  0x2d   : > { %p833_p0 = scmp.ge.s32.totalorder %s1227_s25, 1  ;;  %p202_p1 = scmp.lt.s32.totalorder %s1227_s25, 5 }
  0x2f   : > { %p203_p5 = pnand %p833_p0, %p202_p1 }
  0x30   : > { %s208_s23 = sand.u32 (!%p203_p5), 1, %s1203_s19  }
  0x31   : > { %206 = sbr.rel (%p203_p5) target bundleno = 822 (0x336), region = 36  ;;  %s834_s18 = sshll.u32 (!%p203_p5), %s208_s23, 7 }
  0x32   : > { %s209_s7 = scalar_lea.sflag (!%p203_p5), [#allocation4], %s208_s23  ;;  %s1379_s24 = scalar_lea.vmem (!%p203_p5), [#allocation3], %s834_s18 }
  0x36   : > { %1178 = dma.done.wait (%p1338_p8), %s209_s7, 2048  }
  0x37   : > { %1180 = vsyncadd (%p1338_p8), %s209_s7, 4294965248  ;;  %s238_s28 = sand.u32 1, %s1191_s16   ;;  %p241_p4 = scmp.lt.s32.totalorder %s1215_s22, 1 }
  0x38   : > { %s835_s29 = sshll.u32 %s238_s28, 3  ;;  %p837_p8 = scmp.ne.s32.totalorder %s1211_s21, 0 }
  0x39   : > { %s242_s5 = scalar_select %p241_p4, %s1215_s22, 1 }
  0x3a   : > { %s1395_s30 = scalar_lea.vmem [#allocation6], %s835_s29  ;;  %250 = sbr.rel (%p837_p8) target bundleno = 74 (0x4a), region = 44 }
  0x3b   : > { %s836_s9 = sshll.u32 %s242_s5, 3  ;;  %s838_s8 = sshll.u32 (!%p837_p8), %s1215_s22, 3 }
  0x3c   : > { %s1393_s27 = scalar_lea.vmem %s1715_s2, %s836_s9 }
  0x3f   : > { %v251_v0 = vlaneseq  ;;  %v254_v1 = vstv %s838_s8  ;;  %v839_v3 = vld [vmem:[%s1713_s0] ss:$0 sm:$0xff]  ;;  %v1232_v5 = vmov 0.0  }
  0x41   : > { %v252_v2 = vshrl.u32 %v251_v0, 7 }
  0x43   : > { %v255_v4 = vadd.s32 %v254_v1, %v252_v2 }
  0x45   : > { %vm261_vm0 = vcmp.eq.s32.totalorder %v839_v3, %v255_v4 }
  0x46   : > { %v840_v6 = vsel %vm261_vm0, 1.0, %v1232_v5 }
  0x47   : > { %v264_v7 = vpack.c.bf16 %v840_v6, %v840_v6 }
  0x49   : > { %265 = vst [vmem:[#allocation2] sm:$0xf] %v264_v7 }
  0x4a PF: > { %v287_v8 = vld [vmem:[%s1714_s1 + $0x70] sm:$0xff]  ;;  %v285_v9 = vld [vmem:[%s1714_s1 + $0x60] sm:$0xff]  ;;  %v1233_v10 = vmov 0   ;;  %v288_v11 = vld [vmem:[%s1714_s1 + $0x78] sm:$0xff]  ;;  %v266_v39 = vlaneseq  ;;  %s841_s13 = sshll.u32 %s1211_s21, 8  ;;  %v1750_v7 = vmov 0 }
  0x4b   : > { %1061 = vset.pattern.permute.xlu1 %v1233_v10  ;;  %1060 = vset.pattern.permute.xlu0 %v1233_v10  ;;  %v286_v12 = vld [vmem:[%s1714_s1 + $0x68] sm:$0xff]  ;;  %v284_v13 = vld [vmem:[%s1714_s1 + $0x58] sm:$0xff]  ;;  %v283_v14 = vld [vmem:[%s1714_s1 + $0x50] sm:$0xff]  ;;  %v270_v42 = vstv %s841_s13  ;;  %v1234_v51 = vmov 1.0|1.0  }
  0x4c   : > { %332 = vperm.xlu0 %1060, %v287_v8   ;;  %326 = vperm.xlu1 %1061, %v285_v9   ;;  %v282_v15 = vld [vmem:[%s1714_s1 + $0x48] sm:$0xff]  ;;  %v281_v16 = vld [vmem:[%s1714_s1 + $0x40] sm:$0xff]  ;;  %v280_v17 = vld [vmem:[%s1714_s1 + $0x38] sm:$0xff]  ;;  %v267_v40 = vand.u32 127, %v266_v39 }
  0x4d   : > { %516 = vmatprep.mubr.bf16.mxu0 %v1233_v10  ;;  %v279_v18 = vld [vmem:[%s1714_s1 + $0x30] sm:$0xff]  ;;  %v278_v19 = vld [vmem:[%s1714_s1 + $0x28] sm:$0xff]  ;;  %v277_v20 = vld [vmem:[%s1714_s1 + $0x20] sm:$0xff] }
  0x4e   : > { %v276_v21 = vld [vmem:[%s1714_s1 + $0x18] sm:$0xff]  ;;  %v275_v22 = vld [vmem:[%s1714_s1 + $0x10] sm:$0xff]  ;;  %v274_v23 = vld [vmem:[%s1714_s1 + $0x8] sm:$0xff]  ;;  %v268_v41 = vadd.s32 128, %v267_v40  ;;  %v1471_v48 = vadd.s32 %v270_v42, %v267_v40 }
  0x4f   : > { %v273_v24 = vld [vmem:[%s1714_s1] sm:$0xff]  ;;  %v1064_v27 = vld [vmem:[%s1379_s24 + $0x70] sm:$0xff]   ;;  %v1066_v29 = vld [vmem:[%s1379_s24 + $0x68] sm:$0xff]  }
  0x50   : > { %335 = vperm.xlu0 %1060, %v288_v11   ;;  %329 = vperm.xlu1 %1061, %v286_v12   ;;  %v1062_v25 = vld [vmem:[%s1379_s24 + $0x78] sm:$0xff]   ;;  %v1065_v28 = vld [vmem:[%s1379_s24 + $0x30] sm:$0xff]   ;;  %v1067_v30 = vld [vmem:[%s1379_s24 + $0x28] sm:$0xff]   ;;  %v1467_v44 = vadd.s32 %v270_v42, %v268_v41  ;;  %vm369_vm9 = vcmp.ne.s32.totalorder %v1471_v48, 0 }
  0x51   : > { %v1063_v26 = vld [vmem:[%s1379_s24 + $0x38] sm:$0xff]   ;;  %930 = vmatprep.subr.bf16.mxu1 %v1062_v25  ;;  %v1068_v31 = vld [vmem:[%s1379_s24 + $0x60] sm:$0xff]   ;;  %v1072_v35 = vld [vmem:[%s1379_s24 + $0x50] sm:$0xff]  }
  0x52   : > { %931 = vmatpush3.bf16.msra.mxu1 %v1063_v26  ;;  %v1069_v32 = vld [vmem:[%s1379_s24 + $0x20] sm:$0xff]   ;;  %v1070_v33 = vld [vmem:[%s1379_s24 + $0x58] sm:$0xff]   ;;  %v1073_v36 = vld [vmem:[%s1379_s24 + $0x10] sm:$0xff]   ;;  %vm370_vm2 = vcmp.ne.s32.totalorder %v1467_v44, 0 }
  0x53   : > { %932 = vmatprep.subr.bf16.mxu1 %v1064_v27  ;;  %v1071_v34 = vld [vmem:[%s1379_s24 + $0x18] sm:$0xff]   ;;  %v1074_v37 = vld [vmem:[%s1379_s24 + $0x48] sm:$0xff]   ;;  %v1076_v9 = vld [vmem:[%s1379_s24 + $0x40] sm:$0xff]  }
  0x54   : > { %323 = vperm.xlu1 %1061, %v284_v13   ;;  %320 = vperm.xlu0 %1060, %v283_v14   ;;  %v1075_v38 = vld [vmem:[%s1379_s24 + $0x8] sm:$0xff]   ;;  %v483_v8 = vld [vmem:[#allocation2] sm:$0xf]  ;;  %v1077_v10 = vld [vmem:[%s1379_s24] sm:$0xff]  }
  0x56   : > { %933 = vmatpush3.bf16.msra.mxu1 %v1065_v28 }
  0x57   : > { %934 = vmatprep.subr.bf16.mxu1 %v1066_v29 }
  0x58   : > { %317 = vperm.xlu1 %1061, %v282_v15   ;;  %314 = vperm.xlu0 %1060, %v281_v16  }
  0x5a   : > { %935 = vmatpush3.bf16.msra.mxu1 %v1067_v30 }
  0x5b   : > { %936 = vmatprep.subr.bf16.mxu1 %v1068_v31 }
  0x5c   : > { %311 = vperm.xlu1 %1061, %v280_v17   ;;  %308 = vperm.xlu0 %1060, %v279_v18  }
  0x5e   : > { %937 = vmatpush3.bf16.msra.mxu1 %v1069_v32 }
  0x5f   : > { %938 = vmatprep.subr.bf16.mxu1 %v1070_v33 }
  0x60   : > { %305 = vperm.xlu1 %1061, %v278_v19   ;;  %302 = vperm.xlu0 %1060, %v277_v20  }
  0x62   : > { %939 = vmatpush3.bf16.msra.mxu1 %v1071_v34 }
  0x63   : > { %940 = vmatprep.subr.bf16.mxu1 %v1072_v35 }
  0x64   : > { %299 = vperm.xlu1 %1061, %v276_v21   ;;  %296 = vperm.xlu0 %1060, %v275_v22  }
  0x66   : > { %941 = vmatpush3.bf16.msra.mxu1 %v1073_v36 }
  0x67   : > { %942 = vmatprep.subr.bf16.mxu1 %v1074_v37 }
  0x68   : > { %293 = vperm.xlu1 %1061, %v274_v23   ;;  %290 = vperm.xlu0 %1060, %v273_v24  }
  0x6a   : > { %943 = vmatpush3.bf16.msra.mxu1 %v1075_v38 }
  0x6b   : > { %944 = vmatprep.subr.bf16.mxu1 %v1076_v9 }
  0x6e   : > { %945 = vmatpush3.bf16.msra.mxu1 %v1077_v10 }
  0xc7   : > { %v333_v43 = vpop.permute.xlu0 %332  ;;  %v327_v45 = vpop.permute.xlu1 %326 }
  0xc8   : > { %vm366_vm1 = vcmp.eq.s32.totalorder %v333_v43, %v1467_v44  ;;  %vm361_vm4 = vcmp.eq.s32.totalorder %v327_v45, %v1471_v48  ;;  %vm362_vm6 = vcmp.eq.s32.totalorder %v327_v45, %v1467_v44  ;;  %vm365_vm8 = vcmp.eq.s32.totalorder %v333_v43, %v1471_v48 }
  0xc9   : > { %vm400_vm5 = vmand %vm366_vm1, %vm370_vm2 }
  0xca   : > { %vm1484_vm11 = vmand %vm361_vm4, %vm369_vm9 }
  0xcb   : > { %v336_v46 = vpop.permute.xlu0 %335  ;;  %v330_v47 = vpop.permute.xlu1 %329  ;;  %vm1492_vm13 = vmand %vm362_vm6, %vm370_vm2 }
  0xcc   : > { %vm368_vm3 = vcmp.eq.s32.totalorder %v336_v46, %v1467_v44  ;;  %vm364_vm12 = vcmp.eq.s32.totalorder %v330_v47, %v1467_v44  ;;  %vm367_vm14 = vcmp.eq.s32.totalorder %v336_v46, %v1471_v48  ;;  %vm399_vm15 = vmand %vm365_vm8, %vm369_vm9  ;;  %vm363_vm1 = vcmp.eq.s32.totalorder %v330_v47, %v1471_v48 }
  0xcd   : > { %vm402_vm7 = vmand %vm368_vm3, %vm370_vm2 }
  0xce   : > { %vm874_vm10 = vmpackc.low %vm402_vm7, %vm400_vm5 }
  0xcf   : > { %v324_v49 = vpop.permute.xlu1 %323  ;;  %875 = vmatprep.subr.msk.bf16.mxu0 %vm874_vm10, %v1234_v51  ;;  %vm398_vm0 = vmand %vm364_vm12, %vm370_vm2  ;;  %v321_v53 = vpop.permute.xlu0 %320 }
  0xd0   : > { %vm401_vm3 = vmand %vm367_vm14, %vm369_vm9  ;;  %vm360_vm4 = vcmp.eq.s32.totalorder %v324_v49, %v1467_v44  ;;  %vm358_vm6 = vcmp.eq.s32.totalorder %v321_v53, %v1467_v44  ;;  %vm359_vm10 = vcmp.eq.s32.totalorder %v324_v49, %v1471_v48 }
  0xd1   : > { %vm876_vm5 = vmpackc.low %vm401_vm3, %vm399_vm15 }
  0xd2   : > { %877 = vmatpush1.bf16.msk.msra.mxu0 %vm876_vm5, %v1234_v51  ;;  %vm878_vm7 = vmpackc.low %vm398_vm0, %vm1492_vm13  ;;  %vm357_vm13 = vcmp.eq.s32.totalorder %v321_v53, %v1471_v48 }
  0xd3   : > { %v318_v54 = vpop.permute.xlu1 %317  ;;  %vm397_vm8 = vmand %vm363_vm1, %vm369_vm9  ;;  %879 = vmatprep.subr.msk.bf16.mxu0 %vm878_vm7, %v1234_v51  ;;  %v315_v55 = vpop.permute.xlu0 %314 }
  0xd4   : > { %vm394_vm12 = vmand %vm360_vm4, %vm370_vm2  ;;  %vm356_vm0 = vcmp.eq.s32.totalorder %v318_v54, %v1467_v44  ;;  %vm354_vm3 = vcmp.eq.s32.totalorder %v315_v55, %v1467_v44 }
  0xd5   : > { %vm392_vm14 = vmand %vm358_vm6, %vm370_vm2  ;;  %vm355_vm6 = vcmp.eq.s32.totalorder %v318_v54, %v1471_v48 }
  0xd6   : > { %vm1519_vm15 = vmand %vm359_vm10, %vm369_vm9 }
  0xd7   : > { %vm880_vm1 = vmpackc.low %vm397_vm8, %vm1484_vm11  ;;  %v312_v57 = vpop.permute.xlu1 %311  ;;  %v309_v58 = vpop.permute.xlu0 %308  ;;  %vm353_vm8 = vcmp.eq.s32.totalorder %v315_v55, %v1471_v48 }
  0xd8   : > { %881 = vmatpush1.bf16.msk.msra.mxu0 %vm880_vm1, %v1234_v51  ;;  %vm882_vm4 = vmpackc.low %vm394_vm12, %vm392_vm14  ;;  %vm352_vm12 = vcmp.eq.s32.totalorder %v312_v57, %v1467_v44 }
  0xd9   : > { %vm391_vm5 = vmand %vm357_vm13, %vm369_vm9  ;;  %883 = vmatprep.subr.msk.bf16.mxu0 %vm882_vm4, %v1234_v51  ;;  %vm350_vm13 = vcmp.eq.s32.totalorder %v309_v58, %v1467_v44 }
  0xda   : > { %vm390_vm7 = vmand %vm356_vm0, %vm370_vm2 }
  0xdb   : > { %vm388_vm10 = vmand %vm354_vm3, %vm370_vm2  ;;  %v306_v60 = vpop.permute.xlu1 %305  ;;  %vm351_vm3 = vcmp.eq.s32.totalorder %v312_v57, %v1471_v48  ;;  %v303_v61 = vpop.permute.xlu0 %302 }
  0xdc   : > { %vm1539_vm11 = vmand %vm355_vm6, %vm369_vm9 }
  0xdd   : > { %vm884_vm14 = vmpackc.low %vm1519_vm15, %vm391_vm5  ;;  %vm349_vm5 = vcmp.eq.s32.totalorder %v309_v58, %v1471_v48 }
  0xde   : > { %885 = vmatpush1.bf16.msk.msra.mxu0 %vm884_vm14, %v1234_v51  ;;  %vm886_vm0 = vmpackc.low %vm390_vm7, %vm388_vm10  ;;  %vm347_vm7 = vcmp.eq.s32.totalorder %v306_v60, %v1471_v48  ;;  %vm348_vm10 = vcmp.eq.s32.totalorder %v306_v60, %v1467_v44 }
  0xdf   : > { %vm387_vm1 = vmand %vm353_vm8, %vm369_vm9  ;;  %887 = vmatprep.subr.msk.bf16.mxu0 %vm886_vm0, %v1234_v51  ;;  %v300_v63 = vpop.permute.xlu1 %299  ;;  %vm345_vm0 = vcmp.eq.s32.totalorder %v303_v61, %v1471_v48  ;;  %v297_v1 = vpop.permute.xlu0 %296 }
  0xe0   : > { %vm386_vm4 = vmand %vm352_vm12, %vm370_vm2  ;;  %vm346_vm12 = vcmp.eq.s32.totalorder %v303_v61, %v1467_v44 }
  0xe1   : > { %vm384_vm6 = vmand %vm350_vm13, %vm370_vm2 }
  0xe2   : > { %vm1559_vm15 = vmand %vm351_vm3, %vm369_vm9 }
  0xe3   : > { %vm888_vm8 = vmpackc.low %vm1539_vm11, %vm387_vm1  ;;  %v294_v3 = vpop.permute.xlu1 %293  ;;  %v291_v6 = vpop.permute.xlu0 %290 }
  0xe4   : > { %889 = vmatpush1.bf16.msk.msra.mxu0 %vm888_vm8, %v1234_v51  ;;  %vm890_vm14 = vmpackc.low %vm386_vm4, %vm384_vm6  ;;  %vm343_vm6 = vcmp.eq.s32.totalorder %v300_v63, %v1471_v48 }
  0xe5   : > { %vm383_vm13 = vmand %vm349_vm5, %vm369_vm9  ;;  %891 = vmatprep.subr.msk.bf16.mxu0 %vm890_vm14, %v1234_v51  ;;  %vm344_vm5 = vcmp.eq.s32.totalorder %v300_v63, %v1467_v44  ;;  %vm342_vm14 = vcmp.eq.s32.totalorder %v297_v1, %v1467_v44 }
  0xe6   : > { %vm1576_vm3 = vmand %vm347_vm7, %vm369_vm9 }
  0xe7   : > { %vm382_vm11 = vmand %vm348_vm10, %vm370_vm2  ;;  %vm341_vm10 = vcmp.eq.s32.totalorder %v297_v1, %v1471_v48 }
  0xe8   : > { %vm380_vm1 = vmand %vm346_vm12, %vm370_vm2 }
  0xe9   : > { %vm1586_vm4 = vmand %vm345_vm0, %vm369_vm9 }
  0xea   : > { %vm892_vm7 = vmpackc.low %vm1559_vm15, %vm383_vm13  ;;  %vm339_vm15 = vcmp.eq.s32.totalorder %v294_v3, %v1471_v48 }
  0xeb   : > { %893 = vmatpush1.bf16.msk.msra.mxu0 %vm892_vm7, %v1234_v51  ;;  %vm894_vm8 = vmpackc.low %vm382_vm11, %vm380_vm1  ;;  %vm340_vm11 = vcmp.eq.s32.totalorder %v294_v3, %v1467_v44  ;;  %vm338_vm7 = vcmp.eq.s32.totalorder %v291_v6, %v1467_v44 }
  0xec   : > { %vm1598_vm12 = vmand %vm343_vm6, %vm369_vm9  ;;  %895 = vmatprep.subr.msk.bf16.mxu0 %vm894_vm8, %v1234_v51 }
  0xed   : > { %vm378_vm0 = vmand %vm344_vm5, %vm370_vm2 }
  0xee   : > { %vm1609_vm13 = vmand %vm341_vm10, %vm369_vm9  ;;  %vm337_vm10 = vcmp.eq.s32.totalorder %v291_v6, %v1471_v48 }
  0xef   : > { %vm376_vm1 = vmand %vm342_vm14, %vm370_vm2 }
  0xf0   : > { %vm1618_vm6 = vmand %vm339_vm15, %vm369_vm9 }
  0xf1   : > { %v1751_v7 = vsel %vm1618_vm6, 4294967295, %v1750_v7  ;;  %vm374_vm5 = vmand %vm340_vm11, %vm370_vm2 }
  0xf2   : > { %vm896_vm8 = vmpackc.low %vm1576_vm3, %vm1586_vm4  ;;  %vm1752_vm4 = vnez %v1751_v7 }
  0xf3   : > { %897 = vmatpush1.bf16.msk.msra.mxu0 %vm896_vm8, %v1234_v51  ;;  %vm898_vm14 = vmpackc.low %vm378_vm0, %vm376_vm1 }
  0xf4   : > { %vm372_vm15 = vmand %vm338_vm7, %vm370_vm2  ;;  %899 = vmatprep.subr.msk.bf16.mxu0 %vm898_vm14, %v1234_v51 }
  0xf5   : > { %vm371_vm11 = vmand %vm337_vm10, %vm369_vm9 }
  0xf6   : > { %vm900_vm6 = vmpackc.low %vm1598_vm12, %vm1609_vm13 }
  0xf7   : > { %vm902_vm3 = vmpackc.low %vm374_vm5, %vm372_vm15  ;;  %901 = vmatpush1.bf16.msk.msra.mxu0 %vm900_vm6, %v1234_v51 }
  0xf8   : > { %903 = vmatprep.subr.msk.bf16.mxu0 %vm902_vm3, %v1234_v51  ;;  %vm904_vm0 = vmpackc.low %vm1752_vm4, %vm371_vm11 }
  0xfb   : > { %905 = vmatpush1.bf16.msk.msra.mxu0 %vm904_vm0, %v1234_v51 }
  0xfe   : > { %517 = vmatmul.mubr.bf16.vlgmr.msra.gmra.mxu0 %v483_v8 }
 0x1be   : > { %v518_v11 = vpop.f32.mrf.mxu0 }
 0x1bf   : > { %v525_v14 = vpack.c.bf16 %v518_v11, %v518_v11 }
 0x1c0   : > { %v520_v12 = vpop.f32.mrf.mxu0 }
 0x1c1   : > { %v526_v13 = vpack.c.bf16 %v520_v12, %v520_v12 }
 0x1c2   : > { %v522_v15 = vpop.f32.mrf.mxu0 }
 0x1c3   : > { %687 = vmatprep.mubr.bf16.mxu1 %v526_v13 }
 0x1c4   : > { %v523_v16 = vpop.f32.mrf.mxu0  ;;  %688 = vmatmul.mubr.bf16.vlgmr.msra.gmra.mxu1 %v525_v14 }
 0x284   : > { %v946_v17 = vpop.f32.mrf.mxu1 }
 0x286   : > { %v947_v18 = vpop.f32.mrf.mxu1  ;;  %697 = sbr.rel (%p837_p8) target bundleno = 652 (0x28c), region = 48 }
 0x287   : > { %v948_v19 = vadd.f32 %v947_v18, %v946_v17 }
 0x288   : > { %v949_v20 = vpop.f32.mrf.mxu1 }
 0x28a   : > { %v950_v21 = vpop.f32.mrf.mxu1 }
 0x28b   : > { %698 = vst [vmem:[%s1395_s30] sm:$0xff] %v948_v19 }
 0x28c PF: > { %p923_p6 = scmp.le.s32.totalorder %s1211_s21, 0 }
 0x28e   : > { %702 = sbr.rel (%p923_p6) target bundleno = 663 (0x297), region = 52 }
 0x293   : > { %v703_v22 = vld [vmem:[%s1395_s30] sm:$0xff] }
 0x294   : > { %v704_v23 = vadd.f32 %v948_v19, %v703_v22 }
 0x296   : > { %705 = vst [vmem:[%s1395_s30] sm:$0xff] %v704_v23 }
 0x297 PF: > { %p924_p7 = scmp.ne.s32.totalorder %s1211_s21, 1 }
 0x299   : > { %709 = sbr.rel (%p924_p7) target bundleno = 799 (0x31f), region = 56 }
 0x29e   : > { %v711_v24 = vld [vmem:[%s1393_s27] sm:$0xff]  ;;  %v1235_v25 = vmov 0  }
 0x29f   : > { %1078 = vset.pattern.permute.xlu0 %v1235_v25  ;;  %v710_v26 = vld [vmem:[%s1395_s30] sm:$0xff] }
 0x2a0   : > { %714 = vperm.xlu0 %1078, %v711_v24  }
 0x31b   : > { %v715_v27 = vpop.permute.xlu0 %714 }
 0x31c   : > { %v717_v28 = vmul.f32 %v715_v27, %v710_v26 }
 0x31e   : > { %718 = vst [vmem:[%s1395_s30] sm:$0xff] %v717_v28 }
 0x31f PF: > { %s926_s24 = sshll.u32 %s1215_s22, 7  ;;  %s733_s7 = sshll.u32 %s1395_s30, 4  ;;  %s734_s7 = int_to_ptr.vmem [resolvable:$true] %s733_s7 }
 0x320   : > { %s731_s18 = scalar_lea.hbm %s1717_s4, %s926_s24  ;;  %s720_s27 = scalar_lea.sflag [#allocation5], %s238_s28 }
 0x321   : > { %s1107_s29 = scalar_lea.vmem %s734_s7, 128  ;;  %s1236_s5 = smov [#allocation6]  }
 0x322   : > { %p1108_p9 = scmp.ne.s32.totalorder %s734_s7, %s1107_s29  ;;  %s1111_s9 = sshll.u32 %s1236_s5, 4  ;;  %s1112_s9 = int_to_ptr.vmem [resolvable:$false] %s1111_s9 }
 0x323   : > { %s1113_s26 = scalar_lea.vmem %s1112_s9, 256  ;;  %p1114_p13 = scmp.lt.s32.totalorder %s734_s7, %s1112_s9 }
 0x324   : > { %p1109_p10 = pnand %p1108_p9, %p1350_p12  ;;  %p1115_p3 = scmp.lt.s32.totalorder %s1113_s26, %s1107_s29 }
 0x326   : > { %p1110_p11 = pneg %p1109_p10  ;;  %p1116_p0 = por %p1115_p3, %p1114_p13 }
 0x328   : > { %p1117_p1 = pnand %p1116_p0, %p1110_p11 }
 0x32a   : > { %1120 = shalt.err (!%p1117_p1)
}
 0x32b   : > { %s1121_s22 = scalar_lea.hbm %s731_s18, 128  ;;  %s1125_s10 = scalar_lea.hbm %s1717_s4, 256 }
 0x32c   : > { %p1122_p5 = scmp.ne.s32.totalorder %s731_s18, %s1121_s22  ;;  %p1126_p6 = scmp.lt.s32.totalorder %s731_s18, %s1717_s4 }
 0x32d   : > { %p1127_p7 = scmp.lt.s32.totalorder %s1125_s10, %s1121_s22 }
 0x32e   : > { %p1123_p4 = pnand %p1122_p5, %p1350_p12 }
 0x32f   : > { %p1128_p9 = por %p1127_p7, %p1126_p6 }
 0x330   : > { %p1124_p8 = pneg %p1123_p4 }
 0x332   : > { %p1129_p10 = pnand %p1128_p9, %p1124_p8 }
 0x334   : > { %1132 = shalt.err (!%p1129_p10)
}
 0x335   : > { %954 = dma.vmem_to_hbm [thread:$0]  (%p1350_p12), %s734_s7, 128, %s731_s18, %s720_s27  }
 0x336 PF: > { %p965_p11 = scmp.ge.s32.totalorder %s1227_s25, 2  ;;  %s745_s13 = sand.u32 1, %s1187_s15  }
 0x337   : > { %s746_s24 = scalar_lea.sflag [#allocation5], %s745_s13 }
 0x338   : > { %p961_p13 = pnand %p965_p11, %p1358_p2 }
 0x33a   : > { %p962_p3 = pneg %p961_p13 }
 0x33c   : > { %1182 = dma.done.wait (%p962_p3), %s746_s24, 128  }
 0x33d   : > { %1184 = vsyncadd (%p962_p3), %s746_s24, 4294967168  ;;  %s20_s25 = sadd.s32 1, %s1227_s25   ;;  %s1753_s12 = sld [smem:[#allocation13_spill]] }
 0x33e   : > { %p17_p0 = scmp.ge.s32.totalorder %s20_s25, 6   ;;  %s1754_s21 = sld [smem:[#allocation9_spill]] }
 0x33f   : > { %s1755_s22 = sld [smem:[#allocation10_spill]]  ;;  %s1758_s15 = smov %s1191_s16 }
 0x340   : > { %s1756_s23 = sld [smem:[#allocation11_spill]]  ;;  %s1759_s16 = smov %s1195_s17 }
 0x341   : > { %s1757_s24 = sld [smem:[#allocation12_spill]]  ;;  %s1760_s17 = smov %s1348_s11 }
 0x342   : > { %s1761_s18 = smov %s1203_s19  ;;  %s1762_s19 = smov %s1207_s20 }
 0x343   : > { %s1763_s20 = smov %s1753_s12  ;;  %19 = sbr.rel (!%p17_p0) target bundleno = 9 (0x9), region = 100 }
 0x348   :  { %751 = vsyncpa [#allocation4], 1 }
 0x349   :  { %753 = vsyncpa [#allocation4 + $0x1], 1 }
 0x34a   :  { %754 = vsyncpa [#allocation5], 1 }
 0x34b   :  { %756 = vsyncpa [#allocation5 + $0x1], 1 }

</bundles_post_ra>
